<compile_context>
chip_gen: v7x
topology: tpu7x:2x2x1
jax: 0.10.0
libtpu: 0.0.40
codegen_flags: <defaults>
</compile_context>

<pallas_src>
import functools

import jax
import jax.numpy as jnp
from jax import lax
from jax.experimental import pallas as pl
from jax.experimental.pallas import tpu as pltpu

BN_EPS = 1e-5


def _residual_kernel(x_ref, m1_ref, m2_ref, gb1_ref, gb2_ref, p_ref, out_ref,
                     *, n, h, w, c):
    """Fused  x + relu(ConvBN2(ConvBN1(x)))  on a (N*H, W*C) lane-folded slab."""
    nh = n * h
    lanes = w * c
    inv_cnt = 1.0 / float(n * h * w)

    # Row -> y map for the vertical halo masks (hoisted; shared by both convs).
    y_of_row = lax.broadcasted_iota(jnp.int32, (nh, lanes), 0) % h
    top_ok = (y_of_row != 0).astype(jnp.float32)        # row y-1 exists
    bot_ok = (y_of_row != (h - 1)).astype(jnp.float32)  # row y+1 exists
    zero_row = jnp.zeros((1, lanes), jnp.float32)

    def conv3x3(a, m_ref):
        # a: (N*H, W*C).  Row-shifted copies supply the ky=0 / ky=2 taps; the
        # kx / channel-mix structure (and the x-halo zeros) are baked into the
        # banded matrix, so the whole conv is one MXU matmul.
        prev_rows = jnp.concatenate([zero_row, a[:-1, :]], axis=0) * top_ok
        next_rows = jnp.concatenate([a[1:, :], zero_row], axis=0) * bot_ok
        xexp = jnp.concatenate([prev_rows, a, next_rows], axis=1)  # (N*H, 3*W*C)
        return jnp.dot(xexp, m_ref[...], preferred_element_type=jnp.float32)

    def bn_relu(y, gb_ref):
        # Training-mode BatchNorm2d, one pass: per-lane sum / sum-of-squares,
        # fold same-channel lanes with P, then a single fused FMA + relu.
        rowsum = jnp.sum(y, axis=0, keepdims=True)
        rowsq = jnp.sum(y * y, axis=0, keepdims=True)
        stats = jnp.dot(jnp.concatenate([rowsum, rowsq], axis=0), p_ref[...],
                        preferred_element_type=jnp.float32) * inv_cnt  # (2, W*C)
        mean = stats[0:1, :]
        var = stats[1:2, :] - mean * mean          # biased variance
        scale = gb_ref[0:1, :] * lax.rsqrt(var + BN_EPS)
        bias = gb_ref[1:2, :] - mean * scale
        return jnp.maximum(y * scale + bias, 0.0)

    x = x_ref[...]
    y1 = bn_relu(conv3x3(x, m1_ref), gb1_ref)
    y2 = bn_relu(conv3x3(y1, m2_ref), gb2_ref)
    out_ref[...] = x + y2                          # y2 >= 0 already; no extra relu


def _band_matrix(w_oihw, w, c):
    """(3*W*C, W*C) banded matrix encoding kx-shift, channel mix and x-halo."""
    lanes = w * c
    w_hwio = jnp.transpose(w_oihw, (2, 3, 1, 0)).astype(jnp.float32)  # (ky,kx,ci,co)
    lane = jnp.arange(lanes)
    xpos = lane // c
    ch = lane % c
    dx = xpos[:, None] - xpos[None, :]              # xi - xo
    valid = jnp.abs(dx) <= 1
    kx = jnp.clip(dx + 1, 0, 2)
    ci = jnp.broadcast_to(ch[:, None], (lanes, lanes))
    co = jnp.broadcast_to(ch[None, :], (lanes, lanes))
    vals = w_hwio[:, kx, ci, co]                    # (3, lanes, lanes), ky leading
    m = jnp.where(valid[None, :, :], vals, 0.0)
    return m.reshape(3 * lanes, lanes)


@jax.jit
def residual_forward(x_nchw, w1_oihw, g1, b1, w2_oihw, g2, b2):
    n, c, h, w = x_nchw.shape
    lanes = w * c
    nh = n * h

    # Layout glue: NCHW -> lane-folded (N*H, W*C) slab.  Single transpose, no pad.
    x2d = jnp.transpose(x_nchw, (0, 2, 3, 1)).reshape(nh, lanes).astype(jnp.float32)

    m1 = _band_matrix(w1_oihw, w, c)
    m2 = _band_matrix(w2_oihw, w, c)
    gb1 = jnp.stack([jnp.tile(g1.astype(jnp.float32), w),
                     jnp.tile(b1.astype(jnp.float32), w)], axis=0)   # (2, W*C)
    gb2 = jnp.stack([jnp.tile(g2.astype(jnp.float32), w),
                     jnp.tile(b2.astype(jnp.float32), w)], axis=0)
    lane_ch = jnp.arange(lanes) % c
    p = (lane_ch[:, None] == lane_ch[None, :]).astype(jnp.float32)   # (W*C, W*C)

    kernel = functools.partial(_residual_kernel, n=n, h=h, w=w, c=c)
    vmem = pl.BlockSpec(memory_space=pltpu.MemorySpace.VMEM)
    # TODO(synk): for large N*H*W, tile the row axis over a grid (BN sum/sumsq
    # accumulators + a second normalize pass) and add a parallel axis for
    # v7x's 2 TensorCores; at this size everything is VMEM-resident.
    out2d = pl.pallas_call(
        kernel,
        out_shape=jax.ShapeDtypeStruct((nh, lanes), jnp.float32),
        in_specs=[vmem] * 6,
        out_specs=vmem,
    )(x2d, m1, m2, gb1, gb2, p)
    return jnp.transpose(out2d.reshape(n, h, w, c), (0, 3, 1, 2))  # back to NCHW


# ----------------------------- pure-JAX reference ---------------------------
def _convbn_ref(x, w_oihw, gamma, beta):
    y = lax.conv_general_dilated(
        x, w_oihw, window_strides=(1, 1), padding=((1, 1), (1, 1)),
        dimension_numbers=("NCHW", "OIHW", "NCHW"))
    mean = jnp.mean(y, axis=(0, 2, 3), keepdims=True)
    var = jnp.mean((y - mean) ** 2, axis=(0, 2, 3), keepdims=True)
    yhat = (y - mean) * lax.rsqrt(var + BN_EPS)
    yhat = yhat * gamma.reshape(1, -1, 1, 1) + beta.reshape(1, -1, 1, 1)
    return jnp.maximum(yhat, 0.0)


def residual_ref(x, w1, g1, b1, w2, g2, b2):
    y = _convbn_ref(x, w1, g1, b1)
    y = _convbn_ref(y, w2, g2, b2)
    return x + jnp.maximum(y, 0.0)


if __name__ == "__main__":
    N, C, H, W = 2, 4, 16, 16
    key = jax.random.PRNGKey(0)
    kx, k1, k2 = jax.random.split(key, 3)

    x = jax.random.normal(kx, (N, C, H, W), jnp.float32)

    # Conv2d(c, c, 3, padding=1, bias=False) weights, deterministic init
    fan_in = C * 3 * 3
    bound = (1.0 / fan_in) ** 0.5
    w1 = jax.random.uniform(k1, (C, C, 3, 3), jnp.float32, -bound, bound)
    w2 = jax.random.uniform(k2, (C, C, 3, 3), jnp.float32, -bound, bound)

    # BatchNorm2d params: bn_weight_init=1.0, bias default 0.0
    g1 = jnp.ones((C,), jnp.float32)
    b1 = jnp.zeros((C,), jnp.float32)
    g2 = jnp.ones((C,), jnp.float32)
    b2 = jnp.zeros((C,), jnp.float32)

    out = residual_forward(x, w1, g1, b1, w2, g2, b2)
    out = jax.block_until_ready(out)

    ref = residual_ref(x, w1, g1, b1, w2, g2, b2)
    assert out.shape == (N, C, H, W)
    err = float(jnp.max(jnp.abs(out - ref)))
    assert jnp.allclose(out, ref, atol=1e-4, rtol=1e-4), f"max abs err {err}"

    print("KERNEL_OK")
</pallas_src>

<mosaic_0001>
module attributes {stable_mosaic.version = 11 : i64} {
  func.func @_residual_kernel(%arg0: memref<32x64xf32, #tpu.memory_space<vmem>>, %arg1: memref<192x64xf32, #tpu.memory_space<vmem>>, %arg2: memref<192x64xf32, #tpu.memory_space<vmem>>, %arg3: memref<2x64xf32, #tpu.memory_space<vmem>>, %arg4: memref<2x64xf32, #tpu.memory_space<vmem>>, %arg5: memref<64x64xf32, #tpu.memory_space<vmem>>, %arg6: memref<32x64xf32, #tpu.memory_space<vmem>>) attributes {dimension_semantics = [], scalar_prefetch = 0 : i64, scratch_operands = 0 : i64, tpu.core_type = #tpu.core_type<tc>} {
    %0 = tpu.iota {dimensions = array<i32: 0>} : vector<32x64xi32>
    %c16_i32 = arith.constant 16 : i32
    %c0_i32 = arith.constant 0 : i32
    %1 = arith.cmpi eq, %c16_i32, %c0_i32 : i32
    %c1_i32 = arith.constant 1 : i32
    %2 = arith.select %1, %c1_i32, %c16_i32 : i32
    %3 = vector.broadcast %2 : i32 to vector<32x64xi32>
    %4 = arith.remsi %0, %3 : vector<32x64xi32>
    %c0_i32_0 = arith.constant 0 : i32
    %5 = vector.broadcast %c0_i32_0 : i32 to vector<32x64xi32>
    %6 = arith.cmpi ne, %4, %5 : vector<32x64xi32>
    %c0_i32_1 = arith.constant 0 : i32
    %7 = vector.broadcast %c0_i32_1 : i32 to vector<32x64xi32>
    %8 = arith.cmpi slt, %4, %7 : vector<32x64xi32>
    %c0_i32_2 = arith.constant 0 : i32
    %9 = arith.cmpi slt, %2, %c0_i32_2 : i32
    %10 = vector.broadcast %9 : i1 to vector<32x64xi1>
    %11 = vector.broadcast %10 : vector<32x64xi1> to vector<32x64xi1>
    %12 = arith.xori %8, %11 : vector<32x64xi1>
    %13 = arith.andi %12, %6 : vector<32x64xi1>
    %14 = vector.broadcast %2 : i32 to vector<32x64xi32>
    %15 = arith.addi %4, %14 : vector<32x64xi32>
    %16 = arith.select %13, %15, %4 : vector<32x64xi1>, vector<32x64xi32>
    %c0_i32_3 = arith.constant 0 : i32
    %17 = vector.broadcast %c0_i32_3 : i32 to vector<32x64xi32>
    %18 = arith.cmpi ne, %16, %17 : vector<32x64xi32>
    %19 = arith.extui %18 : vector<32x64xi1> to vector<32x64xi32>
    %20 = arith.sitofp %19 : vector<32x64xi32> to vector<32x64xf32>
    %c15_i32 = arith.constant 15 : i32
    %21 = vector.broadcast %c15_i32 : i32 to vector<32x64xi32>
    %22 = arith.cmpi ne, %16, %21 : vector<32x64xi32>
    %23 = arith.extui %22 : vector<32x64xi1> to vector<32x64xi32>
    %24 = arith.sitofp %23 : vector<32x64xi32> to vector<32x64xf32>
    %cst = arith.constant 0.000000e+00 : f32
    %25 = vector.broadcast %cst : f32 to vector<1x64xf32>
    %c0 = arith.constant 0 : index
    %c0_4 = arith.constant 0 : index
    %26 = vector.load %arg0[%c0, %c0_4] : memref<32x64xf32, #tpu.memory_space<vmem>>, vector<32x64xf32>
    %27 = vector.extract_strided_slice %26 {offsets = [0, 0], sizes = [31, 64], strides = [1, 1]} : vector<32x64xf32> to vector<31x64xf32>
    %28 = tpu.concatenate %25, %27 in 0 : vector<1x64xf32>, vector<31x64xf32> -> vector<32x64xf32>
    %29 = arith.mulf %28, %20 : vector<32x64xf32>
    %30 = vector.extract_strided_slice %26 {offsets = [1, 0], sizes = [31, 64], strides = [1, 1]} : vector<32x64xf32> to vector<31x64xf32>
    %31 = tpu.concatenate %30, %25 in 0 : vector<31x64xf32>, vector<1x64xf32> -> vector<32x64xf32>
    %32 = arith.mulf %31, %24 : vector<32x64xf32>
    %33 = tpu.concatenate %29, %26, %32 in 1 : vector<32x64xf32>, vector<32x64xf32>, vector<32x64xf32> -> vector<32x192xf32>
    %c0_5 = arith.constant 0 : index
    %c0_6 = arith.constant 0 : index
    %34 = vector.load %arg1[%c0_5, %c0_6] : memref<192x64xf32, #tpu.memory_space<vmem>>, vector<192x64xf32>
    %cst_7 = arith.constant dense<0.000000e+00> : vector<32x64xf32>
    %35 = tpu.matmul %33, %34, %cst_7 {dimension_numbers = #tpu.dot_dimension_numbers<[1], [0], [0], [1], [0, 0, 1, 1], [], []>} : vector<32x192xf32>, vector<192x64xf32>, vector<32x64xf32> -> vector<32x64xf32>
    %cst_8 = arith.constant dense<0.000000e+00> : vector<64xf32>
    %36 = vector.multi_reduction <add>, %35, %cst_8 [0] : vector<32x64xf32> to vector<64xf32>
    %37 = vector.shape_cast %36 : vector<64xf32> to vector<1x64xf32>
    %38 = arith.mulf %35, %35 : vector<32x64xf32>
    %cst_9 = arith.constant dense<0.000000e+00> : vector<64xf32>
    %39 = vector.multi_reduction <add>, %38, %cst_9 [0] : vector<32x64xf32> to vector<64xf32>
    %40 = vector.shape_cast %39 : vector<64xf32> to vector<1x64xf32>
    %41 = tpu.concatenate %37, %40 in 0 : vector<1x64xf32>, vector<1x64xf32> -> vector<2x64xf32>
    %c0_10 = arith.constant 0 : index
    %c0_11 = arith.constant 0 : index
    %42 = vector.load %arg5[%c0_10, %c0_11] : memref<64x64xf32, #tpu.memory_space<vmem>>, vector<64x64xf32>
    %cst_12 = arith.constant dense<0.000000e+00> : vector<2x64xf32>
    %43 = tpu.matmul %41, %42, %cst_12 {dimension_numbers = #tpu.dot_dimension_numbers<[1], [0], [0], [1], [0, 0, 1, 1], [], []>} : vector<2x64xf32>, vector<64x64xf32>, vector<2x64xf32> -> vector<2x64xf32>
    %cst_13 = arith.constant 0.001953125 : f32
    %44 = vector.broadcast %cst_13 : f32 to vector<2x64xf32>
    %45 = arith.mulf %43, %44 : vector<2x64xf32>
    %46 = vector.extract_strided_slice %45 {offsets = [0, 0], sizes = [1, 64], strides = [1, 1]} : vector<2x64xf32> to vector<1x64xf32>
    %47 = vector.extract_strided_slice %45 {offsets = [1, 0], sizes = [1, 64], strides = [1, 1]} : vector<2x64xf32> to vector<1x64xf32>
    %48 = arith.mulf %46, %46 : vector<1x64xf32>
    %49 = arith.subf %47, %48 : vector<1x64xf32>
    %c0_14 = arith.constant 0 : index
    %c0_15 = arith.constant 0 : index
    %50 = vector.load %arg3[%c0_14, %c0_15] : memref<2x64xf32, #tpu.memory_space<vmem>>, vector<1x64xf32>
    %cst_16 = arith.constant 9.99999974E-6 : f32
    %51 = vector.broadcast %cst_16 : f32 to vector<1x64xf32>
    %52 = arith.addf %49, %51 : vector<1x64xf32>
    %53 = math.rsqrt %52 : vector<1x64xf32>
    %54 = arith.mulf %50, %53 : vector<1x64xf32>
    %c1 = arith.constant 1 : index
    %c0_17 = arith.constant 0 : index
    %55 = vector.load %arg3[%c1, %c0_17] : memref<2x64xf32, #tpu.memory_space<vmem>>, vector<1x64xf32>
    %56 = arith.mulf %46, %54 : vector<1x64xf32>
    %57 = arith.subf %55, %56 : vector<1x64xf32>
    %58 = vector.broadcast %54 : vector<1x64xf32> to vector<32x64xf32>
    %59 = arith.mulf %35, %58 : vector<32x64xf32>
    %60 = vector.broadcast %57 : vector<1x64xf32> to vector<32x64xf32>
    %61 = arith.addf %59, %60 : vector<32x64xf32>
    %cst_18 = arith.constant 0.000000e+00 : f32
    %62 = vector.broadcast %cst_18 : f32 to vector<32x64xf32>
    %63 = arith.maximumf %61, %62 : vector<32x64xf32>
    %64 = vector.extract_strided_slice %63 {offsets = [0, 0], sizes = [31, 64], strides = [1, 1]} : vector<32x64xf32> to vector<31x64xf32>
    %65 = tpu.concatenate %25, %64 in 0 : vector<1x64xf32>, vector<31x64xf32> -> vector<32x64xf32>
    %66 = arith.mulf %65, %20 : vector<32x64xf32>
    %67 = vector.extract_strided_slice %63 {offsets = [1, 0], sizes = [31, 64], strides = [1, 1]} : vector<32x64xf32> to vector<31x64xf32>
    %68 = tpu.concatenate %67, %25 in 0 : vector<31x64xf32>, vector<1x64xf32> -> vector<32x64xf32>
    %69 = arith.mulf %68, %24 : vector<32x64xf32>
    %70 = tpu.concatenate %66, %63, %69 in 1 : vector<32x64xf32>, vector<32x64xf32>, vector<32x64xf32> -> vector<32x192xf32>
    %c0_19 = arith.constant 0 : index
    %c0_20 = arith.constant 0 : index
    %71 = vector.load %arg2[%c0_19, %c0_20] : memref<192x64xf32, #tpu.memory_space<vmem>>, vector<192x64xf32>
    %cst_21 = arith.constant dense<0.000000e+00> : vector<32x64xf32>
    %72 = tpu.matmul %70, %71, %cst_21 {dimension_numbers = #tpu.dot_dimension_numbers<[1], [0], [0], [1], [0, 0, 1, 1], [], []>} : vector<32x192xf32>, vector<192x64xf32>, vector<32x64xf32> -> vector<32x64xf32>
    %cst_22 = arith.constant dense<0.000000e+00> : vector<64xf32>
    %73 = vector.multi_reduction <add>, %72, %cst_22 [0] : vector<32x64xf32> to vector<64xf32>
    %74 = vector.shape_cast %73 : vector<64xf32> to vector<1x64xf32>
    %75 = arith.mulf %72, %72 : vector<32x64xf32>
    %cst_23 = arith.constant dense<0.000000e+00> : vector<64xf32>
    %76 = vector.multi_reduction <add>, %75, %cst_23 [0] : vector<32x64xf32> to vector<64xf32>
    %77 = vector.shape_cast %76 : vector<64xf32> to vector<1x64xf32>
    %78 = tpu.concatenate %74, %77 in 0 : vector<1x64xf32>, vector<1x64xf32> -> vector<2x64xf32>
    %c0_24 = arith.constant 0 : index
    %c0_25 = arith.constant 0 : index
    %79 = vector.load %arg5[%c0_24, %c0_25] : memref<64x64xf32, #tpu.memory_space<vmem>>, vector<64x64xf32>
    %cst_26 = arith.constant dense<0.000000e+00> : vector<2x64xf32>
    %80 = tpu.matmul %78, %79, %cst_26 {dimension_numbers = #tpu.dot_dimension_numbers<[1], [0], [0], [1], [0, 0, 1, 1], [], []>} : vector<2x64xf32>, vector<64x64xf32>, vector<2x64xf32> -> vector<2x64xf32>
    %cst_27 = arith.constant 0.001953125 : f32
    %81 = vector.broadcast %cst_27 : f32 to vector<2x64xf32>
    %82 = arith.mulf %80, %81 : vector<2x64xf32>
    %83 = vector.extract_strided_slice %82 {offsets = [0, 0], sizes = [1, 64], strides = [1, 1]} : vector<2x64xf32> to vector<1x64xf32>
    %84 = vector.extract_strided_slice %82 {offsets = [1, 0], sizes = [1, 64], strides = [1, 1]} : vector<2x64xf32> to vector<1x64xf32>
    %85 = arith.mulf %83, %83 : vector<1x64xf32>
    %86 = arith.subf %84, %85 : vector<1x64xf32>
    %c0_28 = arith.constant 0 : index
    %c0_29 = arith.constant 0 : index
    %87 = vector.load %arg4[%c0_28, %c0_29] : memref<2x64xf32, #tpu.memory_space<vmem>>, vector<1x64xf32>
    %cst_30 = arith.constant 9.99999974E-6 : f32
    %88 = vector.broadcast %cst_30 : f32 to vector<1x64xf32>
    %89 = arith.addf %86, %88 : vector<1x64xf32>
    %90 = math.rsqrt %89 : vector<1x64xf32>
    %91 = arith.mulf %87, %90 : vector<1x64xf32>
    %c1_31 = arith.constant 1 : index
    %c0_32 = arith.constant 0 : index
    %92 = vector.load %arg4[%c1_31, %c0_32] : memref<2x64xf32, #tpu.memory_space<vmem>>, vector<1x64xf32>
    %93 = arith.mulf %83, %91 : vector<1x64xf32>
    %94 = arith.subf %92, %93 : vector<1x64xf32>
    %95 = vector.broadcast %91 : vector<1x64xf32> to vector<32x64xf32>
    %96 = arith.mulf %72, %95 : vector<32x64xf32>
    %97 = vector.broadcast %94 : vector<1x64xf32> to vector<32x64xf32>
    %98 = arith.addf %96, %97 : vector<32x64xf32>
    %cst_33 = arith.constant 0.000000e+00 : f32
    %99 = vector.broadcast %cst_33 : f32 to vector<32x64xf32>
    %100 = arith.maximumf %98, %99 : vector<32x64xf32>
    %101 = arith.addf %26, %100 : vector<32x64xf32>
    %c0_34 = arith.constant 0 : index
    %c0_35 = arith.constant 0 : index
    %102 = vector.load %arg6[%c0_34, %c0_35] : memref<32x64xf32, #tpu.memory_space<vmem>>, vector<32x64xf32>
    tpu.vector_store %arg6[%c0_34, %c0_35], %101 {strides = array<i32>} : memref<32x64xf32, #tpu.memory_space<vmem>>, vector<32x64xf32>,
    return
  }
}

</mosaic_0001>

<bundles_post_ra>
// kernel: tile.23
= control target key start
LH: loop header
LB: loop body
LE: loop exit
PB: predicated region body
PF: predicated region fallthrough
CT: control target
= control target key end

     0   :  { %s28_s0 = inlined_call_operand.vmem [shape: f32[4], index: 0, kind: input, shape index: {}]   ;;  %s29_s1 = inlined_call_operand.vmem [shape: f32[16,4], index: 1, kind: output, shape index: {}]  }
   0x1   :  { %v4_v0 = vld [vmem:[%s28_s0] ss:$0 sm:$0xff] }
   0x2   :  { %5 = vst [vmem:[%s29_s1] sm:$0xff] %v4_v0  ;;  %8 = vst [vmem:[%s29_s1 + $0x8] sm:$0xff] %v4_v0 }

// kernel: tile.28
= control target key start
LH: loop header
LB: loop body
LE: loop exit
PB: predicated region body
PF: predicated region fallthrough
CT: control target
= control target key end

     0   :  { %s131_s10 = smov 60   ;;  %s132_s11 = smov 52   ;;  %vm3_vm0 = vcmask 31744   ;;  %vm9_vm1 = vcmask 523744   ;;  %vm15_vm2 = vcmask 490944   ;;  %vm21_vm3 = vcmask 458144   ;;  %s207_s0 = inlined_call_operand.vmem [shape: f32[16,4], index: 0, kind: input, shape index: {}]   ;;  %s208_s1 = inlined_call_operand.vmem [shape: f32[1,64], index: 1, kind: output, shape index: {}]  }
   0x1   :  { %v101_v0 = vld [vmem:[%s207_s0 + $0xf] sm:$0x1]   ;;  %v103_v1 = vld [vmem:[%s207_s0 + $0xd] sm:$0x1]   ;;  %v102_v2 = vld [vmem:[%s207_s0 + $0xe] sm:$0x1]  }
   0x2   :  { %7 = vrot.lane.b32.xlu0 %v101_v0, %s131_s10  ;;  %19 = vrot.lane.b32.xlu1 %v103_v1, %s132_s11  ;;  %v104_v3 = vld [vmem:[%s207_s0 + $0xc] sm:$0x1]   ;;  %s133_s16 = smov 56   ;;  %s134_s17 = smov 48   ;;  %v105_v4 = vld [vmem:[%s207_s0 + $0xb] sm:$0x1]  }
   0x3   :  { %v106_v5 = vld [vmem:[%s207_s0 + $0xa] sm:$0x1]   ;;  %v2_v6 = vld [vmem:[%s207_s0] sm:$0x1]   ;;  %s135_s24 = smov 44   ;;  %s136_s25 = smov 40  }
   0x4   :  { %4 = vst.msk [vmem:[#allocation0] sm:$0x1] %vm3_vm0, %v2_v6   ;;  %v107_v7 = vld [vmem:[%s207_s0 + $0x9] sm:$0x1]   ;;  %v108_v8 = vld [vmem:[%s207_s0 + $0x8] sm:$0x1]  }
   0x5   :  { %s137_s30 = smov 36   ;;  %s138_s2 = smov 32   ;;  %v109_v9 = vld [vmem:[%s207_s0 + $0x7] sm:$0x1]   ;;  %v110_v10 = vld [vmem:[%s207_s0 + $0x6] sm:$0x1]  }
   0x6   :  { %13 = vrot.lane.b32.xlu0 %v102_v2, %s133_s16  ;;  %25 = vrot.lane.b32.xlu1 %v104_v3, %s134_s17  ;;  %s139_s7 = smov 28   ;;  %s140_s8 = smov 24   ;;  %v111_v11 = vld [vmem:[%s207_s0 + $0x5] sm:$0x1]   ;;  %v112_v12 = vld [vmem:[%s207_s0 + $0x4] sm:$0x1]  }
   0x7   :  { %s141_s13 = smov 20   ;;  %s142_s14 = smov 16   ;;  %v113_v13 = vld [vmem:[%s207_s0 + $0x3] sm:$0x1]   ;;  %v114_v14 = vld [vmem:[%s207_s0 + $0x2] sm:$0x1]  }
   0x8   :  { %s143_s19 = smov 12   ;;  %s144_s20 = smov 8   ;;  %v115_v15 = vld [vmem:[%s207_s0 + $0x1] sm:$0x1]   ;;  %vm27_vm4 = vcmask 425344   ;;  %vm33_vm5 = vcmask 392544  }
   0x9   :  { %s145_s0 = smov 4   ;;  %vm39_vm6 = vcmask 359744   ;;  %vm45_vm7 = vcmask 326944   ;;  %vm51_vm8 = vcmask 294144   ;;  %vm57_vm9 = vcmask 261344  }
   0xa   :  { %31 = vrot.lane.b32.xlu0 %v105_v4, %s135_s24  ;;  %37 = vrot.lane.b32.xlu1 %v106_v5, %s136_s25  ;;  %vm63_vm10 = vcmask 228544   ;;  %vm69_vm11 = vcmask 195744   ;;  %vm75_vm12 = vcmask 162944   ;;  %vm81_vm13 = vcmask 130144  }
   0xb   :  { %vm87_vm14 = vcmask 97344   ;;  %vm93_vm15 = vcmask 64544  }
   0xe   :  { %43 = vrot.lane.b32.xlu0 %v107_v7, %s137_s30  ;;  %49 = vrot.lane.b32.xlu1 %v108_v8, %s138_s2 }
  0x12   :  { %55 = vrot.lane.b32.xlu0 %v109_v9, %s139_s7  ;;  %61 = vrot.lane.b32.xlu1 %v110_v10, %s140_s8 }
  0x16   :  { %67 = vrot.lane.b32.xlu0 %v111_v11, %s141_s13  ;;  %73 = vrot.lane.b32.xlu1 %v112_v12, %s142_s14 }
  0x1a   :  { %79 = vrot.lane.b32.xlu0 %v113_v13, %s143_s19  ;;  %85 = vrot.lane.b32.xlu1 %v114_v14, %s144_s20 }
  0x1e   :  { %91 = vrot.lane.b32.xlu0 %v115_v15, %s145_s0 }
  0x74   :  { %v8_v16 = vpop.permute.xlu0 %7   ;;  %v20_v17 = vpop.permute.xlu1 %19  }
  0x75   :  { %10 = vst.msk [vmem:[#allocation0] sm:$0x1] %vm9_vm1, %v8_v16  }
  0x78   :  { %v14_v18 = vpop.permute.xlu0 %13   ;;  %v26_v19 = vpop.permute.xlu1 %25  }
  0x79   :  { %16 = vst.msk [vmem:[#allocation0] sm:$0x1] %vm15_vm2, %v14_v18  }
  0x7a   :  { %22 = vst.msk [vmem:[#allocation0] sm:$0x1] %vm21_vm3, %v20_v17  }
  0x7b   :  { %28 = vst.msk [vmem:[#allocation0] sm:$0x1] %vm27_vm4, %v26_v19  }
  0x7c   :  { %v32_v20 = vpop.permute.xlu0 %31   ;;  %v38_v21 = vpop.permute.xlu1 %37  }
  0x7d   :  { %34 = vst.msk [vmem:[#allocation0] sm:$0x1] %vm33_vm5, %v32_v20  }
  0x7e   :  { %40 = vst.msk [vmem:[#allocation0] sm:$0x1] %vm39_vm6, %v38_v21  }
  0x80   :  { %v44_v22 = vpop.permute.xlu0 %43   ;;  %v50_v23 = vpop.permute.xlu1 %49  }
  0x81   :  { %46 = vst.msk [vmem:[#allocation0] sm:$0x1] %vm45_vm7, %v44_v22  }
  0x82   :  { %52 = vst.msk [vmem:[#allocation0] sm:$0x1] %vm51_vm8, %v50_v23  }
  0x84   :  { %v56_v24 = vpop.permute.xlu0 %55   ;;  %v62_v25 = vpop.permute.xlu1 %61  }
  0x85   :  { %58 = vst.msk [vmem:[#allocation0] sm:$0x1] %vm57_vm9, %v56_v24  }
  0x86   :  { %64 = vst.msk [vmem:[#allocation0] sm:$0x1] %vm63_vm10, %v62_v25  }
  0x88   :  { %v68_v26 = vpop.permute.xlu0 %67   ;;  %v74_v27 = vpop.permute.xlu1 %73  }
  0x89   :  { %70 = vst.msk [vmem:[#allocation0] sm:$0x1] %vm69_vm11, %v68_v26  }
  0x8a   :  { %76 = vst.msk [vmem:[#allocation0] sm:$0x1] %vm75_vm12, %v74_v27  }
  0x8c   :  { %v80_v28 = vpop.permute.xlu0 %79   ;;  %v86_v29 = vpop.permute.xlu1 %85  }
  0x8d   :  { %82 = vst.msk [vmem:[#allocation0] sm:$0x1] %vm81_vm13, %v80_v28  }
  0x8e   :  { %88 = vst.msk [vmem:[#allocation0] sm:$0x1] %vm87_vm14, %v86_v29  }
  0x90   :  { %v92_v30 = vpop.permute.xlu0 %91  }
  0x91   :  { %94 = vst.msk [vmem:[#allocation0] sm:$0x1] %vm93_vm15, %v92_v30  }
  0x98   :  { %v98_v31 = vld [vmem:[#allocation0] sm:$0x1] }
  0x99   :  { %100 = vst [vmem:[%s208_s1] sm:$0x1] %v98_v31 }

// kernel: residual_forward.1
= control target key start
LH: loop header
LB: loop body
LE: loop exit
PB: predicated region body
PF: predicated region fallthrough
CT: control target
= control target key end

     0   :  { %v927_v2 = vmov 0.0|0.0   ;;  %s928_s25 = smov 64   ;;  %vm125_vm0 = vcmask 1046528   ;;  %vm154_vm1 = vcmask 523264   ;;  %v23_v44 = vlaneseq  ;;  %s1347_s0 = inlined_call_operand.vmem [shape: f32[32,64], index: 0, kind: input, shape index: {}]   ;;  %s1348_s1 = inlined_call_operand.vmem [shape: f32[192,64], index: 1, kind: input, shape index: {}]   ;;  %s1349_s5 = inlined_call_operand.vmem [shape: f32[64,64], index: 5, kind: input, shape index: {}]   ;;  %s1350_s2 = inlined_call_operand.vmem [shape: f32[192,64], index: 2, kind: input, shape index: {}]   ;;  %s1351_s3 = inlined_call_operand.vmem [shape: f32[2,64], index: 3, kind: input, shape index: {}]   ;;  %s1352_s4 = inlined_call_operand.vmem [shape: f32[2,64], index: 4, kind: input, shape index: {}]   ;;  %s1353_s6 = inlined_call_operand.vmem [shape: f32[32,64], index: 6, kind: output, shape index: {}]  }
   0x1   :  { %v969_v0 = vld [vmem:[%s1347_s0] sm:$0xff]  ;;  %v974_v1 = vld [vmem:[%s1347_s0 + $0x10] sm:$0xff]  ;;  %823 = vmatprep.subr.bf16.mxu0 %v927_v2  ;;  %859 = vmatprep.subr.bf16.mxu1 %v927_v2  ;;  %v988_v4 = vld [vmem:[%s1347_s0 + $0x8] sm:$0xff]  ;;  %vm108_vm3 = vcmask 1040384   ;;  %v929_v54 = vmov 0.0   ;;  %vm930_vm7 = vmmov 0  }
   0x2   :  { %142 = vrot.lane.b32.xlu0 %v969_v0, %s928_s25  ;;  %146 = vrot.lane.b32.xlu1 %v974_v1, %s928_s25  ;;  %v159_v3 = vld [vmem:[%s1348_s1] sm:$0xff]  ;;  %v993_v5 = vld [vmem:[%s1347_s0 + $0x18] sm:$0xff]  ;;  %v126_v7 = vrot.slane %v969_v0, 1  ;;  %v127_v11 = vrot.slane %v988_v4, 1  ;;  %v1086_v45 = vshrl.u32 %v23_v44, 7  ;;  %v109_v50 = vrot.slane %v969_v0, 7 }
   0x3   :  { %v160_v6 = vld [vmem:[%s1348_s1 + $0x8] sm:$0xff]  ;;  %v161_v9 = vld [vmem:[%s1348_s1 + $0x10] sm:$0xff]  ;;  %v162_v10 = vld [vmem:[%s1348_s1 + $0x18] sm:$0xff]  ;;  %v129_v51 = vrot.slane %v974_v1, 1  ;;  %v112_v57 = vrot.slane %v974_v1, 7  ;;  %v110_v62 = vrot.slane %v988_v4, 7  ;;  %801 = vmatprep.mubr.msk.f32.mxu1 %vm930_vm7, %v929_v54 }
   0x4   :  { %v824_v8 = vpack.c.bf16 %v160_v6, %v159_v3  ;;  %v128_v12 = vsel %vm125_vm0, %v126_v7, %v127_v11  ;;  %v827_v13 = vpack.c.bf16 %v162_v10, %v161_v9  ;;  %v163_v14 = vld [vmem:[%s1348_s1 + $0x20] sm:$0xff]  ;;  %v164_v15 = vld [vmem:[%s1348_s1 + $0x28] sm:$0xff]  ;;  %v165_v17 = vld [vmem:[%s1348_s1 + $0x30] sm:$0xff]  ;;  %v25_v46 = vadd.s32 8, %v1086_v45 }
   0x5   :  { %757 = vmatprep.mubr.msk.f32.mxu0 %vm154_vm1, %v128_v12  ;;  %v830_v16 = vpack.c.bf16 %v164_v15, %v163_v14  ;;  %v166_v18 = vld [vmem:[%s1348_s1 + $0x38] sm:$0xff]  ;;  %v167_v20 = vld [vmem:[%s1348_s1 + $0x40] sm:$0xff]  ;;  %v168_v21 = vld [vmem:[%s1348_s1 + $0x48] sm:$0xff]  ;;  %v32_v47 = vand.u32 15, %v1086_v45  ;;  %v26_v49 = vadd.s32 16, %v1086_v45  ;;  %v27_v53 = vadd.s32 24, %v1086_v45 }
   0x6   :  { %144 = vrot.lane.b32.xlu0 %v988_v4, %s928_s25  ;;  %148 = vrot.lane.b32.xlu1 %v993_v5, %s928_s25  ;;  %v833_v19 = vpack.c.bf16 %v166_v18, %v165_v17  ;;  %v836_v22 = vpack.c.bf16 %v168_v21, %v167_v20  ;;  %v169_v23 = vld [vmem:[%s1348_s1 + $0x50] sm:$0xff]  ;;  %v170_v24 = vld [vmem:[%s1348_s1 + $0x58] sm:$0xff]  ;;  %v39_v48 = vand.u32 15, %v25_v46  ;;  %v120_v56 = vsel %vm108_vm3, 0.0, %v109_v50 }
   0x7   :  { %825 = vmatpush1.bf16.msra.mxu0 %v824_v8  ;;  %v839_v25 = vpack.c.bf16 %v170_v24, %v169_v23  ;;  %v171_v26 = vld [vmem:[%s1348_s1 + $0x60] sm:$0xff]  ;;  %v172_v27 = vld [vmem:[%s1348_s1 + $0x68] sm:$0xff]  ;;  %v173_v29 = vld [vmem:[%s1348_s1 + $0x70] sm:$0xff]  ;;  %vm76_vm2 = vcmp.ne.s32.totalorder %v32_v47, 0  ;;  %v46_v52 = vand.u32 15, %v26_v49  ;;  %v130_v59 = vsel %vm125_vm0, %v127_v11, %v129_v51 }
   0x8   :  { %826 = vmatprep.subr.bf16.mxu0 %v927_v2  ;;  %v842_v28 = vpack.c.bf16 %v172_v27, %v171_v26  ;;  %v174_v30 = vld [vmem:[%s1348_s1 + $0x78] sm:$0xff]  ;;  %v175_v32 = vld [vmem:[%s1348_s1 + $0x80] sm:$0xff]  ;;  %v176_v33 = vld [vmem:[%s1348_s1 + $0x88] sm:$0xff]  ;;  %vm89_vm4 = vcmp.ne.s32.totalorder %v39_v48, 15  ;;  %v1094_v55 = vsel %vm76_vm2, 1.0, %v929_v54  ;;  %v53_v61 = vand.u32 15, %v27_v53 }
   0x9   :  { %v845_v31 = vpack.c.bf16 %v174_v30, %v173_v29  ;;  %v848_v34 = vpack.c.bf16 %v176_v33, %v175_v32  ;;  %v177_v35 = vld [vmem:[%s1348_s1 + $0x90] sm:$0xff]  ;;  %v178_v36 = vld [vmem:[%s1348_s1 + $0x98] sm:$0xff]  ;;  %v179_v38 = vld [vmem:[%s1348_s1 + $0xa0] sm:$0xff]  ;;  %v1098_v58 = vsel %vm89_vm4, 1.0, %v929_v54  ;;  %v121_v60 = vmul.f32 %v1094_v55, %v120_v56 }
   0xa   :  { %v851_v37 = vpack.c.bf16 %v178_v36, %v177_v35  ;;  %v180_v39 = vld [vmem:[%s1348_s1 + $0xa8] sm:$0xff]  ;;  %v181_v41 = vld [vmem:[%s1348_s1 + $0xb0] sm:$0xff]  ;;  %v182_v42 = vld [vmem:[%s1348_s1 + $0xb8] sm:$0xff]  ;;  %vm78_vm5 = vcmp.ne.s32.totalorder %v46_v52, 0  ;;  %v139_v63 = vmul.f32 %v1098_v58, %v130_v59  ;;  %v131_v3 = vrot.slane %v993_v5, 1 }
   0xb   :  { %828 = vmatpush1.bf16.msra.mxu0 %v827_v13  ;;  %v854_v40 = vpack.c.bf16 %v180_v39, %v179_v38  ;;  %v857_v43 = vpack.c.bf16 %v182_v42, %v181_v41  ;;  %v1107_v7 = vsel %vm78_vm5, 1.0, %v929_v54  ;;  %v113_v8 = vsel %vm108_vm3, %v110_v62, %v112_v57  ;;  %v311_v24 = vld [vmem:[%s1349_s5] sm:$0xff]  ;;  %v313_v27 = vld [vmem:[%s1349_s5 + $0x10] sm:$0xff] }
   0xc   :  { %829 = vmatprep.subr.bf16.mxu0 %v927_v2  ;;  %vm91_vm6 = vcmp.ne.s32.totalorder %v53_v61, 15  ;;  %v111_v10 = vsel %vm108_vm3, %v109_v50, %v110_v62  ;;  %v123_v12 = vmul.f32 %v1107_v7, %v113_v8  ;;  %v114_v13 = vrot.slane %v993_v5, 7  ;;  %v315_v30 = vld [vmem:[%s1349_s5 + $0x20] sm:$0xff]  ;;  %v317_v33 = vld [vmem:[%s1349_s5 + $0x30] sm:$0xff] }
   0xd   :  { %v132_v15 = vsel %vm125_vm0, %v129_v51, %v131_v3  ;;  %v137_v17 = vsel %vm125_vm0, %v131_v3, 0.0 }
   0xf   :  { %831 = vmatpush1.bf16.msra.mxu0 %v830_v16  ;;  %v1116_v16 = vsel %vm91_vm6, 1.0, %v929_v54 }
  0x10   :  { %832 = vmatprep.subr.bf16.mxu0 %v927_v2  ;;  %v141_v20 = vmul.f32 %v1116_v16, %v137_v17 }
  0x13   :  { %834 = vmatpush1.bf16.msra.mxu0 %v833_v19 }
  0x14   :  { %835 = vmatprep.subr.bf16.mxu0 %v927_v2 }
  0x17   :  { %837 = vmatpush1.bf16.msra.mxu0 %v836_v22  ;;  %v115_v22 = vsel %vm108_vm3, %v112_v57, %v114_v13 }
  0x18   :  { %838 = vmatprep.subr.bf16.mxu0 %v927_v2 }
  0x1b   :  { %840 = vmatpush1.bf16.msra.mxu0 %v839_v25  ;;  %v312_v25 = vld [vmem:[%s1349_s5 + $0x8] sm:$0xff] }
  0x1c   :  { %841 = vmatprep.subr.bf16.mxu0 %v927_v2  ;;  %v860_v26 = vpack.c.bf16 %v312_v25, %v311_v24  ;;  %v483_v25 = vld [vmem:[%s1350_s2 + $0x18] sm:$0xff] }
  0x1e   :  { %861 = vmatpush3.bf16.msra.mxu1 %v860_v26 }
  0x1f   :  { %843 = vmatpush1.bf16.msra.mxu0 %v842_v28  ;;  %862 = vmatprep.subr.bf16.mxu1 %v927_v2  ;;  %v314_v28 = vld [vmem:[%s1349_s5 + $0x18] sm:$0xff] }
  0x20   :  { %844 = vmatprep.subr.bf16.mxu0 %v927_v2  ;;  %v863_v29 = vpack.c.bf16 %v314_v28, %v313_v27  ;;  %v484_v27 = vld [vmem:[%s1350_s2 + $0x20] sm:$0xff]  ;;  %v485_v28 = vld [vmem:[%s1350_s2 + $0x28] sm:$0xff] }
  0x22   :  { %864 = vmatpush3.bf16.msra.mxu1 %v863_v29 }
  0x23   :  { %846 = vmatpush1.bf16.msra.mxu0 %v845_v31  ;;  %865 = vmatprep.subr.bf16.mxu1 %v927_v2  ;;  %v316_v31 = vld [vmem:[%s1349_s5 + $0x28] sm:$0xff] }
  0x24   :  { %847 = vmatprep.subr.bf16.mxu0 %v927_v2  ;;  %v866_v32 = vpack.c.bf16 %v316_v31, %v315_v30  ;;  %v486_v30 = vld [vmem:[%s1350_s2 + $0x30] sm:$0xff]  ;;  %v487_v31 = vld [vmem:[%s1350_s2 + $0x38] sm:$0xff] }
  0x26   :  { %867 = vmatpush3.bf16.msra.mxu1 %v866_v32 }
  0x27   :  { %849 = vmatpush1.bf16.msra.mxu0 %v848_v34  ;;  %v318_v34 = vld [vmem:[%s1349_s5 + $0x38] sm:$0xff]  ;;  %868 = vmatprep.subr.bf16.mxu1 %v927_v2 }
  0x28   :  { %850 = vmatprep.subr.bf16.mxu0 %v927_v2  ;;  %v869_v35 = vpack.c.bf16 %v318_v34, %v317_v33  ;;  %v488_v33 = vld [vmem:[%s1350_s2 + $0x40] sm:$0xff]  ;;  %v489_v34 = vld [vmem:[%s1350_s2 + $0x48] sm:$0xff] }
  0x2a   :  { %870 = vmatpush3.bf16.msra.mxu1 %v869_v35 }
  0x2b   :  { %852 = vmatpush1.bf16.msra.mxu0 %v851_v37  ;;  %871 = vmatprep.subr.bf16.mxu1 %v927_v2 }
  0x2c   :  { %853 = vmatprep.subr.bf16.mxu0 %v927_v2 }
  0x2f   :  { %855 = vmatpush1.bf16.msra.mxu0 %v854_v40 }
  0x30   :  { %856 = vmatprep.subr.bf16.mxu0 %v927_v2 }
  0x33   :  { %858 = vmatpush1.bf16.msra.mxu0 %v857_v43 }
  0x34   :  { %907 = vmatprep.subr.bf16.mxu0 %v927_v2 }
  0x74   :  { %v143_v6 = vpop.permute.xlu0 %142  ;;  %v147_v11 = vpop.permute.xlu1 %146 }
  0x75   :  { %v155_v9 = vsel %vm154_vm1, %v121_v60, %v143_v6  ;;  %v157_v19 = vsel %vm154_vm1, %v123_v12, %v147_v11 }
  0x76   :  { %260 = vmatmul.mubr.f32.vlgmr.msra.gmra.mrb[0].mxu0 %v155_v9 }
  0x77   :  { %758 = vmatprep.mubr.msk.f32.mxu0 %vm154_vm1, %v139_v63  ;;  %909 = vmatpush3.bf16.msra.mxu0 %v860_v26 }
  0x78   :  { %v145_v14 = vpop.permute.xlu0 %144  ;;  %v149_v21 = vpop.permute.xlu1 %148  ;;  %910 = vmatprep.subr.bf16.mxu0 %v927_v2 }
  0x79   :  { %v156_v18 = vsel %vm154_vm1, %v111_v10, %v145_v14  ;;  %v158_v23 = vsel %vm154_vm1, %v115_v22, %v149_v21  ;;  %v480_v21 = vld [vmem:[%s1350_s2] sm:$0xff]  ;;  %v481_v22 = vld [vmem:[%s1350_s2 + $0x8] sm:$0xff] }
  0x7a   :  { %265 = vmatmul.mubr.f32.gmra.mrb[2].mxu0 %v156_v18  ;;  %v872_v24 = vpack.c.bf16 %v481_v22, %v480_v21 }
  0x7b   :  { %759 = vmatprep.mubr.msk.f32.mxu0 %vm154_vm1, %v132_v15  ;;  %912 = vmatpush3.bf16.msra.mxu0 %v863_v29  ;;  %v878_v29 = vpack.c.bf16 %v485_v28, %v484_v27 }
  0x7c   :  { %913 = vmatprep.subr.bf16.mxu0 %v927_v2 }
  0x7e   :  { %270 = vmatmul.mubr.f32.gmra.mrb[4].mxu0 %v157_v19 }
  0x7f   :  { %760 = vmatprep.mubr.msk.f32.mxu0 %vm154_vm1, %v141_v20  ;;  %915 = vmatpush3.bf16.msra.mxu0 %v866_v32  ;;  %v881_v32 = vpack.c.bf16 %v487_v31, %v486_v30 }
  0x80   :  { %916 = vmatprep.subr.bf16.mxu0 %v927_v2 }
  0x82   :  { %275 = vmatmul.mubr.f32.gmra.mrb[6].mxu0 %v158_v23  ;;  %v482_v23 = vld [vmem:[%s1350_s2 + $0x10] sm:$0xff] }
  0x83   :  { %820 = vmatprep.mubr.msk.f32.mxu0 %vm930_vm7, %v929_v54  ;;  %918 = vmatpush3.bf16.msra.mxu0 %v869_v35  ;;  %v875_v26 = vpack.c.bf16 %v483_v25, %v482_v23  ;;  %v884_v35 = vpack.c.bf16 %v489_v34, %v488_v33 }
 0x149   :  { %v1157_v36 = vpop.f32.mrb[0].mxu0 }
 0x14a   :  { %v263_v37 = vpop.f32.mrb[1].mxu0  ;;  %v293_v38 = vmul.f32 %v1157_v36, %v1157_v36  ;;  %v280_v40 = vsel %vm154_vm1, %v1157_v36, 0.0 }
 0x14b   :  { %v490_v37 = vld [vmem:[%s1350_s2 + $0x50] sm:$0xff] }
 0x14c   :  { %v297_v46 = vsel %vm154_vm1, %v293_v38, 0.0  ;;  %v491_v38 = vld [vmem:[%s1350_s2 + $0x58] sm:$0xff] }
 0x14d   :  { %v1161_v39 = vpop.f32.mrb[2].mxu0 }
 0x14e   :  { %v281_v41 = vsel %vm154_vm1, %v1161_v39, 0.0  ;;  %v294_v42 = vmul.f32 %v1161_v39, %v1161_v39  ;;  %v268_v43 = vpop.f32.mrb[3].mxu0 }
 0x14f   :  { %v282_v44 = vadd.f32 %v281_v41, %v280_v40  ;;  %v887_v40 = vpack.c.bf16 %v491_v38, %v490_v37  ;;  %v492_v41 = vld [vmem:[%s1350_s2 + $0x60] sm:$0xff] }
 0x150   :  { %v298_v47 = vsel %vm154_vm1, %v294_v42, 0.0  ;;  %v493_v42 = vld [vmem:[%s1350_s2 + $0x68] sm:$0xff] }
 0x151   :  { %v299_v48 = vadd.f32 %v298_v47, %v297_v46  ;;  %v1171_v49 = vpop.f32.mrb[4].mxu0  ;;  %v890_v43 = vpack.c.bf16 %v493_v42, %v492_v41  ;;  %v495_v46 = vld [vmem:[%s1350_s2 + $0x78] sm:$0xff] }
 0x152   :  { %v283_v50 = vsel %vm154_vm1, %v1171_v49, 0.0  ;;  %v295_v51 = vmul.f32 %v1171_v49, %v1171_v49  ;;  %v273_v52 = vpop.f32.mrb[5].mxu0 }
 0x153   :  { %v284_v53 = vadd.f32 %v283_v50, %v282_v44  ;;  %v494_v44 = vld [vmem:[%s1350_s2 + $0x70] sm:$0xff]  ;;  %v497_v50 = vld [vmem:[%s1350_s2 + $0x88] sm:$0xff] }
 0x154   :  { %v300_v54 = vsel %vm154_vm1, %v295_v51, 0.0  ;;  %v893_v47 = vpack.c.bf16 %v495_v46, %v494_v44  ;;  %v498_v52 = vld [vmem:[%s1350_s2 + $0x90] sm:$0xff] }
 0x155   :  { %v301_v56 = vadd.f32 %v300_v54, %v299_v48  ;;  %v1178_v57 = vpop.f32.mrb[6].mxu0  ;;  %v496_v48 = vld [vmem:[%s1350_s2 + $0x80] sm:$0xff] }
 0x156   :  { %v285_v59 = vsel %vm154_vm1, %v1178_v57, 0.0  ;;  %v296_v60 = vmul.f32 %v1178_v57, %v1178_v57  ;;  %v278_v61 = vpop.f32.mrb[7].mxu0  ;;  %v896_v51 = vpack.c.bf16 %v497_v50, %v496_v48 }
 0x157   :  { %v286_v62 = vadd.f32 %v285_v59, %v284_v53  ;;  %v499_v53 = vld [vmem:[%s1350_s2 + $0x98] sm:$0xff]  ;;  %v501_v59 = vld [vmem:[%s1350_s2 + $0xa8] sm:$0xff]  ;;  %v502_v61 = vld [vmem:[%s1350_s2 + $0xb0] sm:$0xff] }
 0x158   :  { %v302_v63 = vsel %vm154_vm1, %v296_v60, 0.0  ;;  %v899_v54 = vpack.c.bf16 %v499_v53, %v498_v52 }
 0x159   :  { %v287_v3 = vrot.slane %v286_v62, 4  ;;  %v303_v6 = vadd.f32 %v302_v63, %v301_v56  ;;  %v500_v56 = vld [vmem:[%s1350_s2 + $0xa0] sm:$0xff] }
 0x15a   :  { %v902_v60 = vpack.c.bf16 %v501_v59, %v500_v56 }
 0x15b   :  { %v288_v8 = vadd.f32 %v287_v3, %v286_v62  ;;  %v304_v9 = vrot.slane %v303_v6, 4  ;;  %v503_v62 = vld [vmem:[%s1350_s2 + $0xb8] sm:$0xff] }
 0x15c   :  { %v905_v63 = vpack.c.bf16 %v503_v62, %v502_v61 }
 0x15d   :  { %v289_v10 = vrot.slane %v288_v8, 2  ;;  %v305_v11 = vadd.f32 %v304_v9, %v303_v6 }
 0x15f   :  { %v290_v12 = vadd.f32 %v289_v10, %v288_v8  ;;  %v306_v13 = vrot.slane %v305_v11, 2 }
 0x161   :  { %v291_v14 = vrot.slane %v290_v12, 1  ;;  %v307_v15 = vadd.f32 %v306_v13, %v305_v11 }
 0x163   :  { %v308_v17 = vrot.slane %v307_v15, 1  ;;  %v292_v18 = vadd.f32 %v291_v14, %v290_v12  ;;  %v398_v14 = vld [vmem:[%s1351_s3] sm:$0x1] }
 0x165   :  { %v309_v19 = vadd.f32 %v308_v17, %v307_v15  ;;  %v1274_v17 = vsub.s32 0, %v1086_v45 }
 0x167   :  { %v310_v20 = vsel %vm108_vm3, %v292_v18, %v309_v19 }
 0x168   :  { %802 = vmatmul.mubr.msk.f32.vlgmr.msra.gmra.mrb[0].mxu1 %vm154_vm1, %v310_v20 }
 0x169   :  { %873 = vmatpush1.bf16.msra.mxu1 %v872_v24 }
 0x16a   :  { %874 = vmatprep.subr.bf16.mxu1 %v927_v2 }
 0x16d   :  { %876 = vmatpush1.bf16.msra.mxu1 %v875_v26 }
 0x16e   :  { %877 = vmatprep.subr.bf16.mxu1 %v927_v2 }
 0x171   :  { %879 = vmatpush1.bf16.msra.mxu1 %v878_v29 }
 0x172   :  { %880 = vmatprep.subr.bf16.mxu1 %v927_v2 }
 0x175   :  { %882 = vmatpush1.bf16.msra.mxu1 %v881_v32 }
 0x176   :  { %883 = vmatprep.subr.bf16.mxu1 %v927_v2 }
 0x179   :  { %885 = vmatpush1.bf16.msra.mxu1 %v884_v35 }
 0x17a   :  { %886 = vmatprep.subr.bf16.mxu1 %v927_v2 }
 0x17d   :  { %888 = vmatpush1.bf16.msra.mxu1 %v887_v40 }
 0x17e   :  { %889 = vmatprep.subr.bf16.mxu1 %v927_v2 }
 0x181   :  { %891 = vmatpush1.bf16.msra.mxu1 %v890_v43 }
 0x182   :  { %892 = vmatprep.subr.bf16.mxu1 %v927_v2 }
 0x185   :  { %894 = vmatpush1.bf16.msra.mxu1 %v893_v47 }
 0x186   :  { %895 = vmatprep.subr.bf16.mxu1 %v927_v2 }
 0x189   :  { %897 = vmatpush1.bf16.msra.mxu1 %v896_v51 }
 0x18a   :  { %898 = vmatprep.subr.bf16.mxu1 %v927_v2 }
 0x18d   :  { %900 = vmatpush1.bf16.msra.mxu1 %v899_v54 }
 0x18e   :  { %901 = vmatprep.subr.bf16.mxu1 %v927_v2 }
 0x191   :  { %903 = vmatpush1.bf16.msra.mxu1 %v902_v60 }
 0x192   :  { %904 = vmatprep.subr.bf16.mxu1 %v927_v2  ;;  %v405_v2 = vld [vmem:[%s1351_s3 + $0x1] sm:$0x1] }
 0x195   :  { %906 = vmatpush1.bf16.msra.mxu1 %v905_v63 }
 0x23b   :  { %v388_v3 = vpop.f32.mrb[0].mxu1 }
 0x23c   :  { %v392_v6 = vmul.f32 0.001953125, %v388_v3  ;;  %v803_v8 = vpop.f32.mrb[1].mxu1 }
 0x23e   :  { %v393_v9 = vmul.f32 %v392_v6, %v392_v6 }
 0x240   :  { %v395_v10 = vrot.slane %v393_v9, 7 }
 0x242   :  { %v397_v11 = vsub.f32 %v392_v6, %v395_v10 }
 0x244   :  { %v399_v12 = vadd.f32 1e-05, %v397_v11 }
 0x246   :  { %923 = vrsqrt.f32 %v399_v12 }
 0x250   :  { %v924_v13 = vpop.eup %923 }
 0x251   :  { %v402_v15 = vrot.slane %v924_v13, 1 }
 0x253   :  { %v404_v18 = vmul.f32 %v402_v15, %v398_v14 }
 0x255   :  { %v406_v19 = vmul.f32 %v404_v18, %v392_v6  ;;  %v411_v20 = vrot.slane %v404_v18, %v1274_v17 }
 0x257   :  { %v407_v21 = vsub.f32 %v405_v2, %v406_v19  ;;  %v413_v22 = vmul.f32 %v411_v20, %v1161_v39  ;;  %v412_v23 = vmul.f32 %v411_v20, %v1157_v36  ;;  %v415_v24 = vmul.f32 %v411_v20, %v1178_v57 }
 0x258   :  { %v414_v25 = vmul.f32 %v411_v20, %v1171_v49 }
 0x259   :  { %v419_v45 = vrot.slane %v407_v21, %v1274_v17 }
 0x25b   :  { %v421_v26 = vadd.f32 %v419_v45, %v413_v22  ;;  %v420_v27 = vadd.f32 %v419_v45, %v412_v23  ;;  %v423_v28 = vadd.f32 %v419_v45, %v415_v24  ;;  %v422_v29 = vadd.f32 %v419_v45, %v414_v25 }
 0x25d   :  { %v425_v30 = vmax.f32 %v421_v26, 0.0  ;;  %v424_v31 = vmax.f32 %v420_v27, 0.0  ;;  %v427_v32 = vmax.f32 %v423_v28, 0.0  ;;  %v426_v33 = vmax.f32 %v422_v29, 0.0 }
 0x25f   :  { %466 = vrot.lane.b32.xlu1 %v425_v30, %s928_s25  ;;  %464 = vrot.lane.b32.xlu0 %v424_v31, %s928_s25  ;;  %v432_v39 = vrot.slane %v424_v31, 7  ;;  %v448_v36 = vrot.slane %v424_v31, 1  ;;  %v449_v34 = vrot.slane %v425_v30, 1  ;;  %v435_v57 = vrot.slane %v426_v33, 7 }
 0x260   :  { %v451_v35 = vrot.slane %v426_v33, 1  ;;  %v433_v49 = vrot.slane %v425_v30, 7  ;;  %v453_v37 = vrot.slane %v427_v32, 1  ;;  %v437_v38 = vrot.slane %v427_v32, 7 }
 0x261   :  { %v450_v40 = vsel %vm125_vm0, %v448_v36, %v449_v34  ;;  %v443_v47 = vsel %vm108_vm3, 0.0, %v432_v39 }
 0x262   :  { %762 = vmatprep.mubr.msk.f32.mxu1 %vm154_vm1, %v450_v40  ;;  %v452_v41 = vsel %vm125_vm0, %v449_v34, %v451_v35  ;;  %v434_v42 = vsel %vm108_vm3, %v432_v39, %v433_v49  ;;  %v454_v43 = vsel %vm125_vm0, %v451_v35, %v453_v37  ;;  %v436_v44 = vsel %vm108_vm3, %v433_v49, %v435_v57 }
 0x263   :  { %470 = vrot.lane.b32.xlu1 %v427_v32, %s928_s25  ;;  %468 = vrot.lane.b32.xlu0 %v426_v33, %s928_s25  ;;  %v438_v46 = vsel %vm108_vm3, %v435_v57, %v437_v38  ;;  %v444_v48 = vmul.f32 %v1094_v55, %v443_v47  ;;  %v461_v52 = vmul.f32 %v1098_v58, %v452_v41  ;;  %v459_v59 = vsel %vm125_vm0, %v453_v37, 0.0 }
 0x264   :  { %v446_v60 = vmul.f32 %v1107_v7, %v436_v44  ;;  %v463_v61 = vmul.f32 %v1116_v16, %v459_v59 }
 0x2d1   :  { %v465_v50 = vpop.permute.xlu0 %464  ;;  %v467_v53 = vpop.permute.xlu1 %466 }
 0x2d2   :  { %v476_v51 = vsel %vm154_vm1, %v444_v48, %v465_v50  ;;  %v477_v54 = vsel %vm154_vm1, %v434_v42, %v467_v53  ;;  %v711_v50 = vld [vmem:[%s1352_s4] sm:$0x1]  ;;  %v718_v53 = vld [vmem:[%s1352_s4 + $0x1] sm:$0x1] }
 0x2d3   :  { %581 = vmatmul.mubr.f32.vlgmr.msra.gmra.mrb[2].mxu1 %v476_v51 }
 0x2d4   :  { %763 = vmatprep.mubr.msk.f32.mxu1 %vm154_vm1, %v461_v52 }
 0x2d5   :  { %v469_v56 = vpop.permute.xlu0 %468  ;;  %v471_v62 = vpop.permute.xlu1 %470 }
 0x2d6   :  { %v478_v55 = vsel %vm154_vm1, %v446_v60, %v469_v56  ;;  %v479_v58 = vsel %vm154_vm1, %v438_v46, %v471_v62 }
 0x2d7   :  { %586 = vmatmul.mubr.f32.gmra.mrb[4].mxu1 %v477_v54 }
 0x2d8   :  { %764 = vmatprep.mubr.msk.f32.mxu1 %vm154_vm1, %v454_v43 }
 0x2db   :  { %591 = vmatmul.mubr.f32.gmra.mrb[6].mxu1 %v478_v55 }
 0x2dc   :  { %765 = vmatprep.mubr.msk.f32.mxu1 %vm154_vm1, %v463_v61 }
 0x2df   :  { %596 = vmatmul.mubr.f32.gmra.mrb[8].mxu1 %v479_v58 }
 0x3a6   :  { %v582_v63 = vpop.f32.mrb[2].mxu1 }
 0x3a7   :  { %v584_v3 = vpop.f32.mrb[3].mxu1  ;;  %v614_v6 = vmul.f32 %v582_v63, %v582_v63  ;;  %v601_v9 = vsel %vm154_vm1, %v582_v63, 0.0 }
 0x3a9   :  { %v618_v16 = vsel %vm154_vm1, %v614_v6, 0.0 }
 0x3aa   :  { %v587_v8 = vpop.f32.mrb[4].mxu1 }
 0x3ab   :  { %v602_v10 = vsel %vm154_vm1, %v587_v8, 0.0  ;;  %v615_v7 = vmul.f32 %v587_v8, %v587_v8  ;;  %v589_v11 = vpop.f32.mrb[5].mxu1 }
 0x3ac   :  { %v603_v12 = vadd.f32 %v602_v10, %v601_v9 }
 0x3ad   :  { %v619_v13 = vsel %vm154_vm1, %v615_v7, 0.0 }
 0x3ae   :  { %v620_v14 = vadd.f32 %v619_v13, %v618_v16  ;;  %v592_v15 = vpop.f32.mrb[6].mxu1 }
 0x3af   :  { %v604_v18 = vsel %vm154_vm1, %v592_v15, 0.0  ;;  %v616_v2 = vmul.f32 %v592_v15, %v592_v15  ;;  %v594_v19 = vpop.f32.mrb[7].mxu1 }
 0x3b0   :  { %v605_v20 = vadd.f32 %v604_v18, %v603_v12 }
 0x3b1   :  { %v621_v21 = vsel %vm154_vm1, %v616_v2, 0.0 }
 0x3b2   :  { %v622_v22 = vadd.f32 %v621_v21, %v620_v14  ;;  %v597_v23 = vpop.f32.mrb[8].mxu1 }
 0x3b3   :  { %v606_v24 = vsel %vm154_vm1, %v597_v23, 0.0  ;;  %v617_v25 = vmul.f32 %v597_v23, %v597_v23  ;;  %v599_v45 = vpop.f32.mrb[9].mxu1 }
 0x3b4   :  { %v607_v26 = vadd.f32 %v606_v24, %v605_v20 }
 0x3b5   :  { %v623_v27 = vsel %vm154_vm1, %v617_v25, 0.0 }
 0x3b6   :  { %v608_v28 = vrot.slane %v607_v26, 4  ;;  %v624_v29 = vadd.f32 %v623_v27, %v622_v22 }
 0x3b8   :  { %v609_v30 = vadd.f32 %v608_v28, %v607_v26  ;;  %v625_v31 = vrot.slane %v624_v29, 4 }
 0x3ba   :  { %v610_v32 = vrot.slane %v609_v30, 2  ;;  %v626_v33 = vadd.f32 %v625_v31, %v624_v29 }
 0x3bc   :  { %v611_v39 = vadd.f32 %v610_v32, %v609_v30  ;;  %v627_v36 = vrot.slane %v626_v33, 2 }
 0x3be   :  { %v612_v34 = vrot.slane %v611_v39, 1  ;;  %v628_v57 = vadd.f32 %v627_v36, %v626_v33 }
 0x3c0   :  { %v629_v35 = vrot.slane %v628_v57, 1  ;;  %v613_v49 = vadd.f32 %v612_v34, %v611_v39 }
 0x3c2   :  { %v630_v37 = vadd.f32 %v629_v35, %v628_v57 }
 0x3c4   :  { %v631_v38 = vsel %vm108_vm3, %v613_v49, %v630_v37 }
 0x3c5   :  { %821 = vmatmul.mubr.msk.f32.vlgmr.msra.gmra.mrb[8].mxu0 %vm154_vm1, %v631_v38 }
 0x498   :  { %v701_v40 = vpop.f32.mrb[8].mxu0 }
 0x499   :  { %v705_v41 = vmul.f32 0.001953125, %v701_v40  ;;  %v822_v42 = vpop.f32.mrb[9].mxu0 }
 0x49b   :  { %v706_v43 = vmul.f32 %v705_v41, %v705_v41 }
 0x49d   :  { %v708_v44 = vrot.slane %v706_v43, 7 }
 0x49f   :  { %v710_v46 = vsub.f32 %v705_v41, %v708_v44 }
 0x4a1   :  { %v712_v47 = vadd.f32 1e-05, %v710_v46 }
 0x4a3   :  { %925 = vrsqrt.f32 %v712_v47 }
 0x4ad   :  { %v926_v48 = vpop.eup %925 }
 0x4ae   :  { %v715_v51 = vrot.slane %v926_v48, 1 }
 0x4b0   :  { %v717_v52 = vmul.f32 %v715_v51, %v711_v50 }
 0x4b2   :  { %v719_v54 = vmul.f32 %v717_v52, %v705_v41  ;;  %v724_v56 = vrot.slane %v717_v52, %v1274_v17 }
 0x4b4   :  { %v720_v59 = vsub.f32 %v718_v53, %v719_v54  ;;  %v725_v60 = vmul.f32 %v724_v56, %v582_v63  ;;  %v726_v55 = vmul.f32 %v724_v56, %v587_v8  ;;  %v727_v61 = vmul.f32 %v724_v56, %v592_v15 }
 0x4b5   :  { %v728_v62 = vmul.f32 %v724_v56, %v597_v23 }
 0x4b6   :  { %v732_v58 = vrot.slane %v720_v59, %v1274_v17 }
 0x4b8   :  { %v733_v3 = vadd.f32 %v732_v58, %v725_v60  ;;  %v734_v6 = vadd.f32 %v732_v58, %v726_v55  ;;  %v735_v9 = vadd.f32 %v732_v58, %v727_v61  ;;  %v736_v10 = vadd.f32 %v732_v58, %v728_v62 }
 0x4ba   :  { %v737_v7 = vmax.f32 %v733_v3, 0.0  ;;  %v738_v11 = vmax.f32 %v734_v6, 0.0  ;;  %v739_v12 = vmax.f32 %v735_v9, 0.0  ;;  %v740_v16 = vmax.f32 %v736_v10, 0.0 }
 0x4bc   :  { %v741_v13 = vadd.f32 %v737_v7, %v969_v0  ;;  %v742_v14 = vadd.f32 %v738_v11, %v988_v4  ;;  %v743_v18 = vadd.f32 %v739_v12, %v974_v1  ;;  %v744_v63 = vadd.f32 %v740_v16, %v993_v5 }
 0x4be   :  { %745 = vst.msk [vmem:[%s1353_s6] sm:$0xff] %vm154_vm1, %v741_v13  ;;  %746 = vst.msk [vmem:[%s1353_s6 + $0x8] sm:$0xff] %vm154_vm1, %v742_v14 }
 0x4bf   :  { %747 = vst.msk [vmem:[%s1353_s6 + $0x10] sm:$0xff] %vm154_vm1, %v743_v18  ;;  %748 = vst.msk [vmem:[%s1353_s6 + $0x18] sm:$0xff] %vm154_vm1, %v744_v63 }

</bundles_post_ra>
